<compile_context>
chip_gen: v6e
topology: v6e:2x2x1
jax: 0.10.0
libtpu: 0.0.40
codegen_flags: <defaults>
</compile_context>

<pallas_src>
import jax
import jax.numpy as jnp
from jax.experimental import pallas as pl
from jax.experimental.pallas import tpu as pltpu


# Leaves headroom under v7x's 64 MiB physical VMEM (v5e/v6e have 128 MiB).
_VMEM_LIMIT_BYTES = 48 * 1024 * 1024


def _control_step(q, control, context_bf16, wu, bu, wa_row):
    """One ControlUnit reasoning step on one [Bt] batch tile (values, not refs).

    q           : [Bt, D]    f32   tanh(question @ W1 + b1)
    control     : [Bt, D]    f32   previous control state
    context_bf16: [Bt, L, D] bf16
    wu          : [2D, D]    bf16  Linear(2D, D) weight, (in, out) layout
    bu          : [1, D]     f32
    wa_row      : [1, D]     f32   attn Linear(D, 1) weight as a row (ba is
                                   dropped: constant along softmax axis).
    """
    # control_input_u[step] on cat([control, q], dim=1): single K=2D matmul.
    # Lane-concat is free (no cross-lane movement); K=2D=256 matches the
    # v6e/v7x MXU natively and decomposes into two K=128 passes on v5e.
    cq = jnp.concatenate(
        [control.astype(jnp.bfloat16), q.astype(jnp.bfloat16)], axis=-1)
    q2 = jnp.dot(cq, wu, preferred_element_type=jnp.float32) + bu       # [Bt, D]

    # attn logits: (q2 * context) @ wa == context . (q2 * wa).  Folding wa into
    # q2 removes the Linear(D, 1) pass; contracting D as a bf16 batched
    # dot_general keeps the [Bt, L, D] product un-materialized and the logits
    # tile lane-dense [Bt, L].
    q2w = (q2 * wa_row).astype(jnp.bfloat16)                            # [Bt, D]
    logits = jnp.einsum("bqd,bld->bql", q2w[:, None, :], context_bf16,
                        preferred_element_type=jnp.float32)[:, 0, :]    # [Bt, L]

    # softmax over the sequence axis in f32 (VPU/EUP); approx reciprocal -> EUP.
    m = jnp.max(logits, axis=-1, keepdims=True)
    e = jnp.exp(logits - m)
    attn = e * pl.reciprocal(jnp.sum(e, axis=-1, keepdims=True), approx=True)

    # next_control = (attn * context).sum(1): bf16 operands, f32 accumulation.
    # TODO(synk): for small L the fused VPU form
    #             jnp.sum(attn[:, :, None] * context, axis=1) may beat these
    #             M=1 MXU matmuls -- needs a per-chip bundle-dump comparison.
    out = jnp.einsum("bql,bld->bqd", attn[:, None, :].astype(jnp.bfloat16),
                     context_bf16, preferred_element_type=jnp.float32)
    return out[:, 0, :]                                                 # [Bt, D]


def control_unit_step_kernel(step_ref, question_ref, context_ref, control_ref,
                             w1_ref, b1_ref, wu_ref, bu_ref, wa_ref, out_ref):
    """Single reasoning step; the step index only drives the Wu/bu index_maps."""
    del step_ref  # consumed by the index_maps (scalar prefetch)
    # control_input: Linear(D, D) + Tanh (bf16 MXU operands, f32 accumulate).
    q = jnp.tanh(
        jnp.dot(question_ref[...].astype(jnp.bfloat16), w1_ref[...],
                preferred_element_type=jnp.float32) + b1_ref[...])      # [Bt, D]
    out_ref[...] = _control_step(q, control_ref[...], context_ref[...],
                                 wu_ref[0], bu_ref[0], wa_ref[...])


def control_unit_all_steps_kernel(question_ref, context_ref, control0_ref,
                                  w1_ref, b1_ref, wu_ref, bu_ref, wa_ref,
                                  out_ref, q_scratch, ctrl_scratch):
    """All reasoning steps fused: grid = (batch blocks, steps); control carried
    in VMEM scratch, step-invariant q computed once at step 0."""
    step = pl.program_id(1)

    @pl.when(step == 0)
    def _():
        q_scratch[...] = jnp.tanh(
            jnp.dot(question_ref[...].astype(jnp.bfloat16), w1_ref[...],
                    preferred_element_type=jnp.float32) + b1_ref[...])
        ctrl_scratch[...] = control0_ref[...]

    next_control = _control_step(q_scratch[...], ctrl_scratch[...],
                                 context_ref[...], wu_ref[0], bu_ref[0],
                                 wa_ref[...])
    ctrl_scratch[...] = next_control
    out_ref[0] = next_control


def prepare_params(params):
    """One-time conversion of PyTorch-layout params into kernel layout.

    Transposes to [in, out], keeps Wu as one [2D, D] tile per step (single
    K=2D matmul in-kernel), casts matmul weights to bf16.
    """
    D = params["w1"].shape[0]
    max_step = params["wu"].shape[0]
    return {
        "w1_t": params["w1"].T.astype(jnp.bfloat16),                     # [D, D]
        "b1": params["b1"].reshape(1, D).astype(jnp.float32),
        "wu_t": jnp.swapaxes(params["wu"], 1, 2).astype(jnp.bfloat16),   # [S, 2D, D]
        "bu": params["bu"].reshape(max_step, 1, D).astype(jnp.float32),
        "wa_row": params["wa"].reshape(1, D).astype(jnp.float32),
        # "ba" intentionally dropped: constant along softmax axis -> cancels.
    }


def _pick_block_b(B, max_block=128):
    """Batch tile: large for DMA efficiency, but guarantee >= 2 grid steps once
    B >= 16 so the 'parallel' batch axis can shard across v7x's 2 TensorCores
    (no effect on v5e/v6e, which have 1 TC)."""
    if B <= 8:
        return B
    half = (B + 1) // 2
    half = ((half + 7) // 8) * 8          # keep sublane-aligned blocks
    return min(max_block, half)


def _common_in_specs(block_b, L, D):
    # index_maps take (batch_block, step_selector) where the step selector is
    # either the scalar-prefetch ref (single-step) or the step grid axis (fused).
    return [
        pl.BlockSpec((block_b, D), lambda i, s: (i, 0)),          # question
        pl.BlockSpec((block_b, L, D), lambda i, s: (i, 0, 0)),    # context (bf16)
        pl.BlockSpec((block_b, D), lambda i, s: (i, 0)),          # control
        pl.BlockSpec((D, D), lambda i, s: (0, 0)),                # w1_t
        pl.BlockSpec((1, D), lambda i, s: (0, 0)),                # b1
    ]


def control_unit_forward(question, context, control, question_lengths, step,
                         kernel_params):
    """One ControlUnit reasoning step (matches the PyTorch forward signature)."""
    del question_lengths  # the PyTorch forward never applies mask()
    B, L, D = context.shape
    block_b = _pick_block_b(B)
    grid_b = pl.cdiv(B, block_b)
    # HBM-bound on context at real batch sizes: ship it as bf16 (no-op if the
    # caller already cast it once upstream, which is the recommended path).
    context = context.astype(jnp.bfloat16)
    step_arr = jnp.asarray([step], dtype=jnp.int32)

    grid_spec = pltpu.PrefetchScalarGridSpec(
        num_scalar_prefetch=1,
        grid=(grid_b,),
        in_specs=_common_in_specs(block_b, L, D) + [
            pl.BlockSpec((1, 2 * D, D), lambda i, s: (s[0], 0, 0)),  # wu_t[step]
            pl.BlockSpec((1, 1, D), lambda i, s: (s[0], 0, 0)),      # bu[step]
            pl.BlockSpec((1, D), lambda i, s: (0, 0)),               # wa_row
        ],
        out_specs=pl.BlockSpec((block_b, D), lambda i, s: (i, 0)),
    )
    return pl.pallas_call(
        control_unit_step_kernel,
        out_shape=jax.ShapeDtypeStruct((B, D), jnp.float32),
        grid_spec=grid_spec,
        compiler_params=pltpu.CompilerParams(
            dimension_semantics=("parallel",),
            vmem_limit_bytes=_VMEM_LIMIT_BYTES),
    )(step_arr, question, context, control,
      kernel_params["w1_t"], kernel_params["b1"],
      kernel_params["wu_t"], kernel_params["bu"], kernel_params["wa_row"])


def control_unit_forward_all_steps(question, context, control0,
                                   question_lengths, kernel_params):
    """All max_step reasoning steps fused into one pallas_call.

    Returns the per-step controls, shape [max_step, B, D] (control after each
    step); control0 is the initial control state.
    """
    del question_lengths  # the PyTorch forward never applies mask()
    B, L, D = context.shape
    S = kernel_params["wu_t"].shape[0]
    block_b = _pick_block_b(B)
    grid_b = pl.cdiv(B, block_b)
    context = context.astype(jnp.bfloat16)

    grid_spec = pltpu.PrefetchScalarGridSpec(
        num_scalar_prefetch=0,
        grid=(grid_b, S),
        in_specs=_common_in_specs(block_b, L, D) + [
            pl.BlockSpec((1, 2 * D, D), lambda i, s: (s, 0, 0)),     # wu_t[s]
            pl.BlockSpec((1, 1, D), lambda i, s: (s, 0, 0)),         # bu[s]
            pl.BlockSpec((1, D), lambda i, s: (0, 0)),               # wa_row
        ],
        out_specs=pl.BlockSpec((1, block_b, D), lambda i, s: (s, i, 0)),
        scratch_shapes=[pltpu.VMEM((block_b, D), jnp.float32),   # q (hoisted)
                        pltpu.VMEM((block_b, D), jnp.float32)],  # control carry
    )
    return pl.pallas_call(
        control_unit_all_steps_kernel,
        out_shape=jax.ShapeDtypeStruct((S, B, D), jnp.float32),
        grid_spec=grid_spec,
        compiler_params=pltpu.CompilerParams(
            dimension_semantics=("parallel", "arbitrary"),
            vmem_limit_bytes=_VMEM_LIMIT_BYTES),
    )(question, context, control0,
      kernel_params["w1_t"], kernel_params["b1"],
      kernel_params["wu_t"], kernel_params["bu"], kernel_params["wa_row"])


def control_unit_reference(question, context, control, step, params):
    """Pure-JAX f32 reference matching the PyTorch module (CLEVR_DIALOG=True)."""
    q = jnp.tanh(question @ params["w1"].T + params["b1"])
    qcat = jnp.concatenate([control, q], axis=1)
    q2 = qcat @ params["wu"][step].T + params["bu"][step]
    inter = q2[:, None, :] * context
    logits = inter @ params["wa"].T + params["ba"]
    attn = jax.nn.softmax(logits, axis=1)
    return (attn * context).sum(axis=1)


def init_params(key, module_dim, max_step):
    """Deterministic synthetic parameter init (shapes follow PyTorch __init__)."""
    D = module_dim
    ks = jax.random.split(key, 6)
    scale = 1.0 / jnp.sqrt(D)
    return {
        # control_input: Linear(D, D)
        "w1": jax.random.uniform(ks[0], (D, D), jnp.float32, -scale, scale),
        "b1": jax.random.uniform(ks[1], (D,), jnp.float32, -scale, scale),
        # control_input_u: max_step x Linear(2D, D)  (CLEVR_DIALOG=True)
        "wu": jax.random.uniform(ks[2], (max_step, D, 2 * D), jnp.float32,
                                 -scale, scale),
        "bu": jax.random.uniform(ks[3], (max_step, D), jnp.float32, -scale, scale),
        # attn: Linear(D, 1)
        "wa": jax.random.uniform(ks[4], (1, D), jnp.float32, -scale, scale),
        "ba": jax.random.uniform(ks[5], (1,), jnp.float32, -scale, scale),
    }


if __name__ == "__main__":
    # Lane/sublane-dense small shapes: D=128 (lanes), B=8 (sublanes), L=16.
    B, L, D = 8, 16, 128
    max_step, step = 4, 1

    key = jax.random.PRNGKey(0)
    k_q, k_ctx, k_ctrl, k_p = jax.random.split(key, 4)

    question = jax.random.normal(k_q, (B, D), jnp.float32)
    context = jax.random.normal(k_ctx, (B, L, D), jnp.float32)
    control = jax.random.normal(k_ctrl, (B, D), jnp.float32)
    question_lengths = jnp.full((B,), L, dtype=jnp.int32)   # unused in forward

    params = init_params(k_p, D, max_step)
    kernel_params = prepare_params(params)          # one-time layout/dtype prep
    context_bf16 = context.astype(jnp.bfloat16)     # one-time bf16 cast upstream

    # --- single reasoning step (matches the module's forward signature) -----
    out = control_unit_forward(question, context_bf16, control,
                               question_lengths, step, kernel_params)
    out = jax.block_until_ready(out)
    ref = control_unit_reference(question, context, control, step, params)
    assert out.shape == (B, D)
    # bf16 weights/context/operands + approx reciprocal -> relaxed tolerance.
    assert jnp.allclose(out, ref, atol=5e-2, rtol=5e-2), (
        "single-step max abs err", float(jnp.max(jnp.abs(out - ref))))

    # --- fused multi-step path (all steps in one pallas_call) ---------------
    all_ctrl = control_unit_forward_all_steps(question, context_bf16, control,
                                              question_lengths, kernel_params)
    all_ctrl = jax.block_until_ready(all_ctrl)
    assert all_ctrl.shape == (max_step, B, D)
    ref_ctrl = control
    for s in range(max_step):
        ref_ctrl = control_unit_reference(question, context, ref_ctrl, s, params)
        # errors compound mildly across carried steps -> slightly looser bound
        assert jnp.allclose(all_ctrl[s], ref_ctrl, atol=1e-1, rtol=1e-1), (
            "fused step", s, float(jnp.max(jnp.abs(all_ctrl[s] - ref_ctrl))))

    print("KERNEL_OK")
</pallas_src>

<mosaic_0001>
module attributes {stable_mosaic.version = 11 : i64} {
  func.func @control_unit_step_kernel(%arg0: i32, %arg1: memref<1xi32, #tpu.memory_space<smem>>, %arg2: memref<8x128xf32, #tpu.memory_space<vmem>>, %arg3: memref<8x16x128xbf16, #tpu.memory_space<vmem>>, %arg4: memref<8x128xf32, #tpu.memory_space<vmem>>, %arg5: memref<128x128xbf16, #tpu.memory_space<vmem>>, %arg6: memref<1x128xf32, #tpu.memory_space<vmem>>, %arg7: memref<1x256x128xbf16, #tpu.memory_space<vmem>>, %arg8: memref<1x1x128xf32, #tpu.memory_space<vmem>>, %arg9: memref<1x128xf32, #tpu.memory_space<vmem>>, %arg10: memref<8x128xf32, #tpu.memory_space<vmem>>) attributes {dimension_semantics = [#tpu.dimension_semantics<parallel>], iteration_bounds = array<i64: 1>, scalar_prefetch = 1 : i64, scratch_operands = 0 : i64, tpu.core_type = #tpu.core_type<tc>, window_params = [{transform_indices = @transform_0, window_bounds = array<i64: 8, 128>}, {transform_indices = @transform_1, window_bounds = array<i64: 8, 16, 128>}, {transform_indices = @transform_2, window_bounds = array<i64: 8, 128>}, {pipeline_mode = #tpu.pipeline_mode<synchronous>, transform_indices = @transform_3, window_bounds = array<i64: 128, 128>}, {pipeline_mode = #tpu.pipeline_mode<synchronous>, transform_indices = @transform_4, window_bounds = array<i64: 1, 128>}, {transform_indices = @transform_5, window_bounds = array<i64: 1, 256, 128>}, {transform_indices = @transform_6, window_bounds = array<i64: 1, 1, 128>}, {pipeline_mode = #tpu.pipeline_mode<synchronous>, transform_indices = @transform_7, window_bounds = array<i64: 1, 128>}, {transform_indices = @transform_8, window_bounds = array<i64: 8, 128>}]} {
    %c0 = arith.constant 0 : index
    %c0_0 = arith.constant 0 : index
    %0 = vector.load %arg2[%c0, %c0_0] : memref<8x128xf32, #tpu.memory_space<vmem>>, vector<8x128xf32>
    %1 = arith.truncf %0 : vector<8x128xf32> to vector<8x128xbf16>
    %c0_1 = arith.constant 0 : index
    %c0_2 = arith.constant 0 : index
    %2 = vector.load %arg5[%c0_1, %c0_2] : memref<128x128xbf16, #tpu.memory_space<vmem>>, vector<128x128xbf16>
    %cst = arith.constant dense<0.000000e+00> : vector<8x128xf32>
    %3 = tpu.matmul %1, %2, %cst {dimension_numbers = #tpu.dot_dimension_numbers<[1], [0], [0], [1], [0, 0, 1, 1], [], []>} : vector<8x128xbf16>, vector<128x128xbf16>, vector<8x128xf32> -> vector<8x128xf32>
    %c0_3 = arith.constant 0 : index
    %c0_4 = arith.constant 0 : index
    %4 = vector.load %arg6[%c0_3, %c0_4] : memref<1x128xf32, #tpu.memory_space<vmem>>, vector<1x128xf32>
    %5 = vector.broadcast %4 : vector<1x128xf32> to vector<8x128xf32>
    %6 = arith.addf %3, %5 : vector<8x128xf32>
    %7 = math.tanh %6 : vector<8x128xf32>
    %c0_5 = arith.constant 0 : index
    %c0_6 = arith.constant 0 : index
    %8 = vector.load %arg4[%c0_5, %c0_6] : memref<8x128xf32, #tpu.memory_space<vmem>>, vector<8x128xf32>
    %c0_7 = arith.constant 0 : index
    %c0_8 = arith.constant 0 : index
    %c0_9 = arith.constant 0 : index
    %9 = vector.load %arg3[%c0_7, %c0_8, %c0_9] : memref<8x16x128xbf16, #tpu.memory_space<vmem>>, vector<8x16x128xbf16>
    %c0_10 = arith.constant 0 : index
    %c0_11 = arith.constant 0 : index
    %c0_12 = arith.constant 0 : index
    %10 = vector.load %arg7[%c0_10, %c0_11, %c0_12] : memref<1x256x128xbf16, #tpu.memory_space<vmem>>, vector<1x256x128xbf16>
    %11 = vector.shape_cast %10 : vector<1x256x128xbf16> to vector<256x128xbf16>
    %c0_13 = arith.constant 0 : index
    %c0_14 = arith.constant 0 : index
    %c0_15 = arith.constant 0 : index
    %12 = vector.load %arg8[%c0_13, %c0_14, %c0_15] : memref<1x1x128xf32, #tpu.memory_space<vmem>>, vector<1x1x128xf32>
    %13 = vector.shape_cast %12 : vector<1x1x128xf32> to vector<1x128xf32>
    %c0_16 = arith.constant 0 : index
    %c0_17 = arith.constant 0 : index
    %14 = vector.load %arg9[%c0_16, %c0_17] : memref<1x128xf32, #tpu.memory_space<vmem>>, vector<1x128xf32>
    %15 = arith.truncf %8 : vector<8x128xf32> to vector<8x128xbf16>
    %16 = arith.truncf %7 : vector<8x128xf32> to vector<8x128xbf16>
    %17 = tpu.concatenate %15, %16 in 1 : vector<8x128xbf16>, vector<8x128xbf16> -> vector<8x256xbf16>
    %cst_18 = arith.constant dense<0.000000e+00> : vector<8x128xf32>
    %18 = tpu.matmul %17, %11, %cst_18 {dimension_numbers = #tpu.dot_dimension_numbers<[1], [0], [0], [1], [0, 0, 1, 1], [], []>} : vector<8x256xbf16>, vector<256x128xbf16>, vector<8x128xf32> -> vector<8x128xf32>
    %19 = vector.broadcast %13 : vector<1x128xf32> to vector<8x128xf32>
    %20 = arith.addf %18, %19 : vector<8x128xf32>
    %21 = vector.broadcast %14 : vector<1x128xf32> to vector<8x128xf32>
    %22 = arith.mulf %20, %21 : vector<8x128xf32>
    %23 = arith.truncf %22 : vector<8x128xf32> to vector<8x128xbf16>
    %24 = vector.shape_cast %23 : vector<8x128xbf16> to vector<8x1x128xbf16>
    "tpu.trace_start"() <{level = 10 : i32, message = "bqd,bld->bql"}> : () -> ()
    %cst_19 = arith.constant dense<0.000000e+00> : vector<8x1x16xf32>
    %25 = tpu.matmul %24, %9, %cst_19 {dimension_numbers = #tpu.dot_dimension_numbers<[2], [2], [1], [1], [0, 0, 0, 1, 1, 1], [0], [0]>} : vector<8x1x128xbf16>, vector<8x16x128xbf16>, vector<8x1x16xf32> -> vector<8x1x16xf32>
    "tpu.trace_stop"() : () -> ()
    %26 = vector.shape_cast %25 : vector<8x1x16xf32> to vector<8x16xf32>
    %cst_20 = arith.constant dense<0xFF800000> : vector<8xf32>
    %27 = vector.multi_reduction <maximumf>, %26, %cst_20 [1] : vector<8x16xf32> to vector<8xf32>
    %28 = vector.shape_cast %27 : vector<8xf32> to vector<8x1xf32>
    %29 = vector.broadcast %28 : vector<8x1xf32> to vector<8x16xf32>
    %30 = arith.subf %26, %29 : vector<8x16xf32>
    %31 = math.exp %30 : vector<8x16xf32>
    %cst_21 = arith.constant dense<0.000000e+00> : vector<8xf32>
    %32 = vector.multi_reduction <add>, %31, %cst_21 [1] : vector<8x16xf32> to vector<8xf32>
    %33 = vector.shape_cast %32 : vector<8xf32> to vector<8x1xf32>
    %34 = tpu.reciprocal %33 {approx = true} : vector<8x1xf32> -> vector<8x1xf32>
    %35 = vector.broadcast %34 : vector<8x1xf32> to vector<8x16xf32>
    %36 = arith.mulf %31, %35 : vector<8x16xf32>
    %37 = vector.shape_cast %36 : vector<8x16xf32> to vector<8x1x16xf32>
    %38 = arith.truncf %37 : vector<8x1x16xf32> to vector<8x1x16xbf16>
    "tpu.trace_start"() <{level = 10 : i32, message = "bql,bld->bqd"}> : () -> ()
    %cst_22 = arith.constant dense<0.000000e+00> : vector<8x1x128xf32>
    %39 = tpu.matmul %38, %9, %cst_22 {dimension_numbers = #tpu.dot_dimension_numbers<[2], [1], [1], [2], [0, 0, 0, 1, 1, 2], [0], [0]>} : vector<8x1x16xbf16>, vector<8x16x128xbf16>, vector<8x1x128xf32> -> vector<8x1x128xf32>
    "tpu.trace_stop"() : () -> ()
    %40 = vector.shape_cast %39 : vector<8x1x128xf32> to vector<8x128xf32>
    %c0_23 = arith.constant 0 : index
    %c0_24 = arith.constant 0 : index
    %41 = vector.load %arg10[%c0_23, %c0_24] : memref<8x128xf32, #tpu.memory_space<vmem>>, vector<8x128xf32>
    tpu.vector_store %arg10[%c0_23, %c0_24], %40 {strides = array<i32>} : memref<8x128xf32, #tpu.memory_space<vmem>>, vector<8x128xf32>,
    return
  }
  func.func @transform_0(%arg0: i32, %arg1: memref<1xi32, #tpu.memory_space<smem>>) -> (i32, i32) {
    %c0_i32 = arith.constant 0 : i32
    %c0_i32_0 = arith.constant 0 : i32
    return %arg0, %c0_i32 : i32, i32
  }
  func.func @transform_1(%arg0: i32, %arg1: memref<1xi32, #tpu.memory_space<smem>>) -> (i32, i32, i32) {
    %c0_i32 = arith.constant 0 : i32
    %c0_i32_0 = arith.constant 0 : i32
    %c0_i32_1 = arith.constant 0 : i32
    return %arg0, %c0_i32, %c0_i32_0 : i32, i32, i32
  }
  func.func @transform_2(%arg0: i32, %arg1: memref<1xi32, #tpu.memory_space<smem>>) -> (i32, i32) {
    %c0_i32 = arith.constant 0 : i32
    %c0_i32_0 = arith.constant 0 : i32
    return %arg0, %c0_i32 : i32, i32
  }
  func.func @transform_3(%arg0: i32, %arg1: memref<1xi32, #tpu.memory_space<smem>>) -> (i32, i32) {
    %c0_i32 = arith.constant 0 : i32
    %c0_i32_0 = arith.constant 0 : i32
    %c0_i32_1 = arith.constant 0 : i32
    return %c0_i32, %c0_i32_0 : i32, i32
  }
  func.func @transform_4(%arg0: i32, %arg1: memref<1xi32, #tpu.memory_space<smem>>) -> (i32, i32) {
    %c0_i32 = arith.constant 0 : i32
    %c0_i32_0 = arith.constant 0 : i32
    %c0_i32_1 = arith.constant 0 : i32
    return %c0_i32, %c0_i32_0 : i32, i32
  }
  func.func @transform_5(%arg0: i32, %arg1: memref<1xi32, #tpu.memory_space<smem>>) -> (i32, i32, i32) {
    %c0 = arith.constant 0 : index
    %0 = memref.load %arg1[%c0] : memref<1xi32, #tpu.memory_space<smem>>
    %c0_i32 = arith.constant 0 : i32
    %c0_i32_0 = arith.constant 0 : i32
    %c0_i32_1 = arith.constant 0 : i32
    return %0, %c0_i32, %c0_i32_0 : i32, i32, i32
  }
  func.func @transform_6(%arg0: i32, %arg1: memref<1xi32, #tpu.memory_space<smem>>) -> (i32, i32, i32) {
    %c0 = arith.constant 0 : index
    %0 = memref.load %arg1[%c0] : memref<1xi32, #tpu.memory_space<smem>>
    %c0_i32 = arith.constant 0 : i32
    %c0_i32_0 = arith.constant 0 : i32
    %c0_i32_1 = arith.constant 0 : i32
    return %0, %c0_i32, %c0_i32_0 : i32, i32, i32
  }
  func.func @transform_7(%arg0: i32, %arg1: memref<1xi32, #tpu.memory_space<smem>>) -> (i32, i32) {
    %c0_i32 = arith.constant 0 : i32
    %c0_i32_0 = arith.constant 0 : i32
    %c0_i32_1 = arith.constant 0 : i32
    return %c0_i32, %c0_i32_0 : i32, i32
  }
  func.func @transform_8(%arg0: i32, %arg1: memref<1xi32, #tpu.memory_space<smem>>) -> (i32, i32) {
    %c0_i32 = arith.constant 0 : i32
    %c0_i32_0 = arith.constant 0 : i32
    return %arg0, %c0_i32 : i32, i32
  }
}

</mosaic_0001>

<bundles_post_ra>
// kernel: tpu_custom_call.1
= control target key start
LH: loop header
LB: loop body
LE: loop exit
PB: predicated region body
PF: predicated region fallthrough
CT: control target
= control target key end

     0   :  { %15 = vsyncpa [#allocation5], 0  ;;  %s2068_s0 = inlined_call_operand.<no memory space> [shape: s32[1], index: 0, kind: input, shape index: {}]   ;;  %s2069_s1 = inlined_call_operand.hbm [shape: f32[8,128], index: 1, kind: input, shape index: {}]   ;;  %s2070_s2 = inlined_call_operand.hbm [shape: bf16[8,16,128], index: 2, kind: input, shape index: {}]   ;;  %s2071_s3 = inlined_call_operand.hbm [shape: f32[8,128], index: 3, kind: input, shape index: {}]   ;;  %s2072_s4 = inlined_call_operand.hbm [shape: bf16[128,128], index: 4, kind: input, shape index: {}]   ;;  %s2073_s5 = inlined_call_operand.vmem [shape: f32[1,128], index: 5, kind: input, shape index: {}]   ;;  %s2074_s6 = inlined_call_operand.hbm [shape: bf16[4,256,128], index: 6, kind: input, shape index: {}]   ;;  %s2075_s7 = inlined_call_operand.vmem [shape: f32[4,1,128], index: 7, kind: input, shape index: {}]   ;;  %s2076_s8 = inlined_call_operand.vmem [shape: f32[1,128], index: 8, kind: input, shape index: {}]   ;;  %s2077_s9 = inlined_call_operand.hbm [shape: f32[8,128], index: 9, kind: output, shape index: {}]  }
   0x1   :  { %16 = vsyncpa [#allocation8], 0 }
   0x2   :  { %17 = vsyncpa [#allocation11], 0 }
   0x3   :  { %18 = vsyncpa [#allocation6], 0  ;;  %s1827_s30 = smov [#allocation7]  }
   0x4   :  { %s34_s10 = sshll.u32 %s1827_s30, 4  ;;  %s35_s10 = int_to_ptr.vmem [resolvable:$true] %s34_s10 }
   0x5   :  { %s1705_s11 = scalar_lea.vmem %s35_s10, 1024  ;;  %p1710_p1 = scmp.lt.s32.totalorder %s35_s10, %s35_s10 }
   0x6   :  { %p1706_p0 = scmp.ne.s32.totalorder %s35_s10, %s1705_s11  ;;  %p1711_p2 = scmp.lt.s32.totalorder %s1705_s11, %s1705_s11 }
   0x8   :  { %p1712_p3 = por %p1711_p2, %p1710_p1 }
   0xa   :  { %p1713_p4 = pnand %p1712_p3, %p1706_p0 }
   0xc   :  { %1716 = shalt.err (!%p1713_p4)
}
   0xd   :  { %s1828_s12 = smov 64   ;;  %s1829_s13 = smov 4  }
   0xe   :  { %40 = dma.hbm_to_vmem [thread:$0]  %s2070_s2, 1024, %s35_s10, [#allocation8], %s1828_s12, %s1828_s12, %s1829_s13  }
   0xf   :  { %s1830_s16 = smov [#allocation10]   ;;  %s1831_s18 = smov [#allocation4]  }
  0x10   :  { %s56_s17 = sshll.u32 %s1830_s16, 4  ;;  %s25_s19 = sshll.u32 %s1831_s18, 4  ;;  %s57_s17 = int_to_ptr.vmem [resolvable:$true] %s56_s17  ;;  %s26_s19 = int_to_ptr.vmem [resolvable:$true] %s25_s19 }
  0x11   :  { %s1725_s20 = scalar_lea.vmem %s57_s17, 1024  ;;  %p1730_p6 = scmp.lt.s32.totalorder %s57_s17, %s57_s17 }
  0x12   :  { %p1726_p5 = scmp.ne.s32.totalorder %s57_s17, %s1725_s20  ;;  %p1731_p7 = scmp.lt.s32.totalorder %s1725_s20, %s1725_s20 }
  0x14   :  { %p1732_p8 = por %p1731_p7, %p1730_p6 }
  0x16   :  { %p1733_p9 = pnand %p1732_p8, %p1726_p5 }
  0x18   :  { %1736 = shalt.err (!%p1733_p9)
}
  0x19   :  { %62 = dma.hbm_to_vmem [thread:$0]  %s2072_s4, 1024, %s57_s17, [#allocation11], %s1828_s12, %s1828_s12, %s1829_s13  }
  0x1a   :  { %s1745_s2 = scalar_lea.vmem %s26_s19, 128  ;;  %p1750_p11 = scmp.lt.s32.totalorder %s26_s19, %s26_s19 }
  0x1b   :  { %p1746_p10 = scmp.ne.s32.totalorder %s26_s19, %s1745_s2  ;;  %p1751_p12 = scmp.lt.s32.totalorder %s1745_s2, %s1745_s2 }
  0x1d   :  { %p1752_p13 = por %p1751_p12, %p1750_p11 }
  0x1f   :  { %p1753_p0 = pnand %p1752_p13, %p1746_p10 }
  0x21   :  { %1756 = shalt.err (!%p1753_p0)
}
  0x22   :  { %28 = dma.hbm_to_vmem [thread:$0]  %s2069_s1, 128, %s26_s19, [#allocation5]  }
  0x23   :  { %s1832_s25 = smov [#allocation9]   ;;  %s1454_s29 = sshll.u32 %s2068_s0, 11 }
  0x24   :  { %s47_s26 = sshll.u32 %s1832_s25, 4  ;;  %s48_s26 = int_to_ptr.vmem [resolvable:$true] %s47_s26 }
  0x25   :  { %s1765_s4 = scalar_lea.vmem %s48_s26, 128  ;;  %p1770_p2 = scmp.lt.s32.totalorder %s48_s26, %s48_s26 }
  0x26   :  { %p1766_p1 = scmp.ne.s32.totalorder %s48_s26, %s1765_s4  ;;  %p1771_p3 = scmp.lt.s32.totalorder %s1765_s4, %s1765_s4 }
  0x28   :  { %p1772_p4 = por %p1771_p3, %p1770_p2 }
  0x2a   :  { %p1773_p5 = pnand %p1772_p4, %p1766_p1 }
  0x2c   :  { %1776 = shalt.err (!%p1773_p5)
}
  0x2d   :  { %50 = dma.hbm_to_vmem [thread:$0]  %s2071_s3, 128, %s48_s26, [#allocation8]  }
  0x2e   :  { %s73_s14 = scalar_lea.hbm %s2074_s6, %s1454_s29  ;;  %s1833_s15 = smov [#allocation12]  }
  0x2f   :  { %s74_s16 = sshll.u32 %s1833_s15, 4  ;;  %s1777_s17 = scalar_lea.hbm %s73_s14, 2048  ;;  %s75_s16 = int_to_ptr.vmem [resolvable:$true] %s74_s16 }
  0x30   :  { %p1778_p6 = scmp.ne.s32.totalorder %s73_s14, %s1777_s17  ;;  %s1779_s20 = scalar_lea.hbm %s2074_s6, 8192 }
  0x31   :  { %p1780_p7 = scmp.lt.s32.totalorder %s73_s14, %s2074_s6  ;;  %p1781_p8 = scmp.lt.s32.totalorder %s1779_s20, %s1777_s17 }
  0x33   :  { %p1782_p9 = por %p1781_p8, %p1780_p7 }
  0x35   :  { %p1783_p10 = pnand %p1782_p9, %p1778_p6 }
  0x37   :  { %1786 = shalt.err (!%p1783_p10)
}
  0x38   :  { %s1787_s3 = scalar_lea.vmem %s75_s16, 2048  ;;  %p1792_p12 = scmp.lt.s32.totalorder %s75_s16, %s75_s16 }
  0x39   :  { %p1788_p11 = scmp.ne.s32.totalorder %s75_s16, %s1787_s3  ;;  %p1793_p13 = scmp.lt.s32.totalorder %s1787_s3, %s1787_s3 }
  0x3b   :  { %p1794_p0 = por %p1793_p13, %p1792_p12 }
  0x3d   :  { %p1795_p1 = pnand %p1794_p0, %p1788_p11 }
  0x3f   :  { %1798 = shalt.err (!%p1795_p1)
}
  0x40   :  { %80 = dma.hbm_to_vmem [thread:$0]  %s73_s14, 2048, %s75_s16, [#allocation11], %s1828_s12, %s1828_s12, %s1829_s13  }
  0x41   :  { %1819 = dma.done.wait [#allocation5], 128  }
  0x42   :  { %1820 = vsyncadd [#allocation5], 4294967168 }
  0x43   :  { %1821 = dma.done.wait [#allocation8], 1152  }
  0x44   :  { %1822 = vsyncadd [#allocation8], 4294966144 }
  0x45   :  { %1823 = dma.done.wait [#allocation11], 3072  }
  0x46   :  { %1824 = vsyncadd [#allocation11], 4294964224  ;;  %v1834_v0 = vmov 0.0   ;;  %vm1835_vm0 = vmmov 0   ;;  %v1645_v1 = vld [vmem:[#allocation10 + $0x38] sm:$0xff]   ;;  %v1646_v2 = vld [vmem:[#allocation10 + $0x30] sm:$0xff]   ;;  %v437_v41 = vlaneseq }
  0x47   :  { %1518 = vmatprep.subr.bf16.mxu0 %v1834_v0  ;;  %1534 = vmatprep.mubr.msk.bf16.mxu0 %vm1835_vm0, %v1834_v0  ;;  %v1647_v3 = vld [vmem:[#allocation10 + $0x28] sm:$0xff]   ;;  %v1648_v4 = vld [vmem:[#allocation10 + $0x20] sm:$0xff]   ;;  %v1653_v5 = vld [vmem:[#allocation12 + $0x78] sm:$0xff]   ;;  %p111_p2 = scmp.lt.s32.totalorder %s2068_s0, 3  ;;  %v1836_v39 = vmov 1966171168  }
  0x48   :  { %1519 = vmatpush3.bf16.msra.mxu0 %v1645_v1  ;;  %v1654_v6 = vld [vmem:[#allocation12 + $0x38] sm:$0xff]   ;;  %1464 = vmatprep.subr.bf16.mxu1 %v1653_v5  ;;  %v1655_v7 = vld [vmem:[#allocation12 + $0x70] sm:$0xff]   ;;  %v1657_v9 = vld [vmem:[#allocation12 + $0x68] sm:$0xff]   ;;  %v435_v40 = vunpack.c.l.s4 %v1836_v39  ;;  %v438_v47 = vshrl.u32 %v437_v41, 7  ;;  %vm891_vm1 = vcmask 1041409   ;;  %vm894_vm2 = vcmask 1042434  }
  0x49   :  { %1520 = vmatprep.subr.bf16.mxu0 %v1834_v0  ;;  %1465 = vmatpush3.bf16.msra.mxu1 %v1654_v6  ;;  %v1656_v8 = vld [vmem:[#allocation12 + $0x30] sm:$0xff]   ;;  %v1649_v10 = vld [vmem:[#allocation10 + $0x18] sm:$0xff]   ;;  %v1658_v11 = vld [vmem:[#allocation12 + $0x28] sm:$0xff]   ;;  %s2079_s0 = smov (!%p111_p2, %s2068_s0), 3  ;;  %vm897_vm3 = vcmask 1043459   ;;  %vm900_vm4 = vcmask 1044484  }
  0x4a   :  { %1466 = vmatprep.subr.bf16.mxu1 %v1655_v7  ;;  %v1650_v12 = vld [vmem:[#allocation10 + $0x10] sm:$0xff]   ;;  %v1651_v13 = vld [vmem:[#allocation10 + $0x8] sm:$0xff]   ;;  %v1652_v14 = vld [vmem:[#allocation10] sm:$0xff]   ;;  %s113_s26 = scalar_lea.vmem %s2075_s7, %s2079_s0  ;;  %v436_v46 = vunpack.c.0.s8 %v435_v40  ;;  %v469_v58 = vsub.s32 0, %v438_v47  ;;  %vm903_vm5 = vcmask 1045509   ;;  %vm906_vm6 = vcmask 1046534  }
  0x4b   :  { %v116_v15 = vld [vmem:[#allocation4] sm:$0xff]  ;;  %v1659_v17 = vld [vmem:[#allocation12 + $0x60] sm:$0xff]   ;;  %v1661_v19 = vld [vmem:[#allocation12 + $0x58] sm:$0xff]   ;;  %vm909_vm7 = vcmask 1047559   ;;  %vm912_vm8 = vcmask 130048   ;;  %s1837_s0 = smov [#allocation13]  }
  0x4c   :  { %1521 = vmatpush3.bf16.msra.mxu0 %v1646_v2  ;;  %v117_v16 = vpack.c.bf16 %v116_v15, %v116_v15  ;;  %v1660_v18 = vld [vmem:[#allocation12 + $0x20] sm:$0xff]   ;;  %v1662_v20 = vld [vmem:[#allocation12 + $0x18] sm:$0xff]   ;;  %v1663_v21 = vld [vmem:[#allocation12 + $0x50] sm:$0xff]   ;;  %v439_v53 = vsub.s32 %v436_v46, %v438_v47  ;;  %s1389_s7 = sshll.u32 %s1837_s0, 4  ;;  %s1390_s7 = int_to_ptr.vmem [resolvable:$true] %s1389_s7 }
  0x4d   :  { %1522 = vmatprep.subr.bf16.mxu0 %v1834_v0  ;;  %1467 = vmatpush3.bf16.msra.mxu1 %v1656_v8  ;;  %v1664_v22 = vld [vmem:[#allocation12 + $0x10] sm:$0xff]   ;;  %v1665_v23 = vld [vmem:[#allocation12 + $0x48] sm:$0xff]   ;;  %v1667_v25 = vld [vmem:[#allocation12 + $0x40] sm:$0xff]   ;;  %p1804_p4 = scmp.lt.s32.totalorder %s1390_s7, %s1390_s7 }
  0x4e   :  { %1468 = vmatprep.subr.bf16.mxu1 %v1657_v9  ;;  %v1666_v24 = vld [vmem:[#allocation12 + $0x8] sm:$0xff]   ;;  %v1668_v26 = vld [vmem:[#allocation12] sm:$0xff]   ;;  %v1407_v27 = vld [vmem:[%s2073_s5] ss:$0 sm:$0xff] }
  0x4f   :  { %v230_v33 = vld [vmem:[#allocation9] sm:$0xff]  ;;  %v1943_v38 = vld [vmem:[#allocation7 + $0x8] sm:$0xff]   ;;  %v1416_v43 = vld [vmem:[%s113_s26] ss:$0 sm:$0xff] }
  0x50   :  { %1523 = vmatpush3.bf16.msra.mxu0 %v1647_v3  ;;  %v281_v35 = vpack.c.bf16 %v230_v33, %v230_v33  ;;  %v1940_v37 = vld [vmem:[#allocation7] sm:$0xff]   ;;  %v1433_v48 = vld [vmem:[%s2076_s8] ss:$0 sm:$0xff]  ;;  %v1960_v62 = vld [vmem:[#allocation7 + $0x10] sm:$0xff]   ;;  %s1799_s8 = scalar_lea.vmem %s1390_s7, 128 }
  0x51   :  { %1524 = vmatprep.subr.bf16.mxu0 %v1834_v0  ;;  %1469 = vmatpush3.bf16.msra.mxu1 %v1658_v11  ;;  %v1962_v2 = vld [vmem:[#allocation7 + $0x18] sm:$0xff]   ;;  %v1972_v8 = vld [vmem:[#allocation7 + $0x20] sm:$0xff]   ;;  %p1800_p3 = scmp.ne.s32.totalorder %s1390_s7, %s1799_s8  ;;  %p1805_p5 = scmp.lt.s32.totalorder %s1799_s8, %s1799_s8 }
  0x52   :  { %1470 = vmatprep.subr.bf16.mxu1 %v1659_v17 }
  0x53   :  { %p1806_p6 = por %p1805_p5, %p1804_p4 }
  0x54   :  { %1525 = vmatpush3.bf16.msra.mxu0 %v1648_v4 }
  0x55   :  { %1526 = vmatprep.subr.bf16.mxu0 %v1834_v0  ;;  %1471 = vmatpush3.bf16.msra.mxu1 %v1660_v18  ;;  %v1986_v18 = vld [vmem:[#allocation7 + $0x38] sm:$0xff]   ;;  %p1807_p7 = pnand %p1806_p6, %p1800_p3 }
  0x56   :  { %1472 = vmatprep.subr.bf16.mxu1 %v1661_v19 }
  0x58   :  { %1527 = vmatpush3.bf16.msra.mxu0 %v1649_v10  ;;  %v1974_v10 = vld [vmem:[#allocation7 + $0x28] sm:$0xff]  }
  0x59   :  { %1528 = vmatprep.subr.bf16.mxu0 %v1834_v0  ;;  %1473 = vmatpush3.bf16.msra.mxu1 %v1662_v20 }
  0x5a   :  { %1474 = vmatprep.subr.bf16.mxu1 %v1663_v21 }
  0x5c   :  { %1529 = vmatpush3.bf16.msra.mxu0 %v1650_v12 }
  0x5d   :  { %1530 = vmatprep.subr.bf16.mxu0 %v1834_v0  ;;  %1475 = vmatpush3.bf16.msra.mxu1 %v1664_v22 }
  0x5e   :  { %1476 = vmatprep.subr.bf16.mxu1 %v1665_v23 }
  0x60   :  { %1531 = vmatpush3.bf16.msra.mxu0 %v1651_v13 }
  0x61   :  { %1532 = vmatprep.subr.bf16.mxu0 %v1834_v0  ;;  %1477 = vmatpush3.bf16.msra.mxu1 %v1666_v24 }
  0x62   :  { %1478 = vmatprep.subr.bf16.mxu1 %v1667_v25 }
  0x64   :  { %1533 = vmatpush3.bf16.msra.mxu0 %v1652_v14 }
  0x65   :  { %1538 = vmatprep.subr.bf16.mxu0 %v1834_v0  ;;  %1479 = vmatpush3.bf16.msra.mxu1 %v1668_v26 }
  0x66   :  { %1544 = vmatprep.subr.bf16.mxu1 %v1834_v0 }
  0x67   :  { %1535 = vmatmul.mubr.bf16.vlgmr.msra.gmra.mxu0 %v117_v16  ;;  %v1984_v16 = vld [vmem:[#allocation7 + $0x30] sm:$0xff]  }
  0x68   :  { %1540 = vmatprep.mubr.msk.bf16.mxu0 %vm1835_vm0, %v1834_v0  ;;  %1539 = vmatpush3.bf16.xpose.msra.mxu0 %v1940_v37 }
  0x69   :  { %1550 = vmatprep.subr.bf16.mxu0 %v1834_v0 }
 0x127   :  { %v223_v28 = vpop.f32.mrf.mxu0 }
 0x128   :  { %v224_v29 = vadd.f32 %v1407_v27, %v223_v28 }
 0x129   :  { %v1536_v30 = vpop.f32.mrf.mxu0 }
 0x12a   :  { %1677 = vtanh.f32 %v224_v29 }
 0x12b   :  { %v226_v31 = vpop.f32.mrf.mxu0 }
 0x12d   :  { %v1537_v32 = vpop.f32.mrf.mxu0 }
 0x137   :  { %v1678_v34 = vpop.eup %1677 }
 0x138   :  { %v282_v36 = vpack.c.bf16 %v1678_v34, %v1678_v34 }
 0x13a   :  { %417 = vmatprep.mubr.bf16.mxu1 %v282_v36 }
 0x13b   :  { %418 = vmatmul.mubr.bf16.vlgmr.msra.gmra.mxu1 %v281_v35 }
 0x13c   :  { %1546 = vmatprep.mubr.msk.bf16.mxu1 %vm1835_vm0, %v1834_v0  ;;  %1545 = vmatpush3.bf16.xpose.msra.mxu1 %v1943_v38 }
 0x13d   :  { %1556 = vmatprep.subr.bf16.mxu1 %v1834_v0 }
 0x1fb   :  { %v1480_v42 = vpop.f32.mrf.mxu1 }
 0x1fd   :  { %v1481_v44 = vpop.f32.mrf.mxu1 }
 0x1fe   :  { %v1482_v45 = vadd.f32 %v1481_v44, %v1480_v42 }
 0x1ff   :  { %v1483_v49 = vpop.f32.mrf.mxu1 }
 0x200   :  { %v420_v50 = vadd.f32 %v1482_v45, %v1416_v43 }
 0x201   :  { %v1484_v51 = vpop.f32.mrf.mxu1 }
 0x202   :  { %v431_v52 = vmul.f32 %v1433_v48, %v420_v50 }
 0x204   :  { %v432_v54 = vpack.c.bf16 %v431_v52, %v431_v52 }
 0x206   :  { %v440_v55 = vrot.slane %v432_v54, %v439_v53 }
 0x208   :  { %v441_v56 = vcombine.high %v440_v55, %v440_v55  ;;  %v448_v57 = vrot.slane %v440_v55, %v439_v53 }
 0x20a   :  { %v455_v59 = vrot.slane %v441_v56, %v439_v53  ;;  %v1434_v60 = vpack.i.b16 %v448_v57, %v448_v57  ;;  %v459_v61 = vunpack.i.h.s16 %v448_v57  ;;  %v456_v7 = vcombine.high %v448_v57, %v448_v57 }
 0x20c   :  { %v470_v63 = vrot.slane %v1434_v60, %v469_v58  ;;  %v518_v1 = vpack.i.b16 %v459_v61, %v459_v61  ;;  %v461_v4 = vunpack.i.h.s16 %v455_v59  ;;  %v1437_v5 = vpack.i.b16 %v455_v59, %v455_v59 }
 0x20d   :  { %v463_v12 = vunpack.i.h.s16 %v456_v7  ;;  %v1440_v13 = vpack.i.b16 %v456_v7, %v456_v7  ;;  %v457_v15 = vcombine.high %v455_v59, %v455_v59 }
 0x20e   :  { %1541 = vmatmul.mubr.bf16.vlgmr.msra.gmra.mxu0 %v470_v63  ;;  %v522_v3 = vrot.slane %v518_v1, %v469_v58  ;;  %v622_v6 = vpack.i.b16 %v461_v4, %v461_v4  ;;  %v574_v9 = vrot.slane %v1437_v5, %v469_v58 }
 0x20f   :  { %1551 = vmatpush3.bf16.xpose.msra.mxu0 %v1960_v62  ;;  %1552 = vmatprep.mubr.msk.bf16.mxu0 %vm1835_vm0, %v1834_v0  ;;  %v726_v14 = vpack.i.b16 %v463_v12, %v463_v12  ;;  %v678_v17 = vrot.slane %v1440_v13, %v469_v58  ;;  %v465_v20 = vunpack.i.h.s16 %v457_v15  ;;  %v1443_v21 = vpack.i.b16 %v457_v15, %v457_v15 }
 0x210   :  { %1547 = vmatmul.mubr.bf16.vlgmr.msra.gmra.mxu1 %v522_v3  ;;  %1562 = vmatprep.subr.bf16.mxu0 %v1834_v0  ;;  %v626_v11 = vrot.slane %v622_v6, %v469_v58 }
 0x211   :  { %1557 = vmatpush3.bf16.xpose.msra.mxu1 %v1962_v2  ;;  %1558 = vmatprep.mubr.msk.bf16.mxu1 %vm1835_vm0, %v1834_v0  ;;  %v730_v19 = vrot.slane %v726_v14, %v469_v58  ;;  %v830_v22 = vpack.i.b16 %v465_v20, %v465_v20  ;;  %v782_v23 = vrot.slane %v1443_v21, %v469_v58 }
 0x212   :  { %1568 = vmatprep.subr.bf16.mxu1 %v1834_v0 }
 0x213   :  { %v834_v24 = vrot.slane %v830_v22, %v469_v58 }
 0x216   :  { %1553 = vmatmul.mubr.bf16.vlgmr.msra.gmra.mxu0 %v574_v9 }
 0x217   :  { %1563 = vmatpush3.bf16.xpose.msra.mxu0 %v1972_v8  ;;  %1564 = vmatprep.mubr.msk.bf16.mxu0 %vm1835_vm0, %v1834_v0 }
 0x218   :  { %1559 = vmatmul.mubr.bf16.vlgmr.msra.gmra.mxu1 %v626_v11  ;;  %1574 = vmatprep.subr.bf16.mxu0 %v1834_v0 }
 0x219   :  { %1569 = vmatpush3.bf16.xpose.msra.mxu1 %v1974_v10  ;;  %1570 = vmatprep.mubr.msk.bf16.mxu1 %vm1835_vm0, %v1834_v0 }
 0x21a   :  { %1580 = vmatprep.subr.bf16.mxu1 %v1834_v0 }
 0x21e   :  { %1565 = vmatmul.mubr.bf16.vlgmr.msra.gmra.mxu0 %v678_v17 }
 0x21f   :  { %1575 = vmatpush3.bf16.xpose.msra.mxu0 %v1984_v16  ;;  %1576 = vmatprep.mubr.msk.bf16.mxu0 %vm1835_vm0, %v1834_v0 }
 0x220   :  { %1571 = vmatmul.mubr.bf16.vlgmr.msra.gmra.mxu1 %v730_v19  ;;  %1586 = vmatprep.subr.bf16.mxu0 %v1834_v0 }
 0x221   :  { %1581 = vmatpush3.bf16.xpose.msra.mxu1 %v1986_v18  ;;  %1582 = vmatprep.mubr.msk.bf16.mxu1 %vm1835_vm0, %v1834_v0 }
 0x222   :  { %1592 = vmatprep.subr.bf16.mxu1 %v1834_v0 }
 0x226   :  { %1577 = vmatmul.mubr.bf16.vlgmr.msra.gmra.mxu0 %v782_v23 }
 0x227   :  { %1587 = vmatpush3.bf16.msra.mxu0 %v1940_v37  ;;  %1588 = vmatprep.mubr.msk.bf16.mxu0 %vm1835_vm0, %v1834_v0 }
 0x228   :  { %1583 = vmatmul.mubr.bf16.vlgmr.msra.gmra.mxu1 %v834_v24  ;;  %1598 = vmatprep.subr.bf16.mxu0 %v1834_v0 }
 0x229   :  { %1593 = vmatpush3.bf16.msra.mxu1 %v1943_v38  ;;  %1594 = vmatprep.mubr.msk.bf16.mxu1 %vm1835_vm0, %v1834_v0 }
 0x22a   :  { %1604 = vmatprep.subr.bf16.mxu1 %v1834_v0 }
 0x2ce   :  { %v2004_v25 = vpop.f32.mrf.mxu0 }
 0x2d0   :  { %v1542_v26 = vpop.f32.mrf.mxu0  ;;  %v2006_v27 = vpop.f32.mrf.mxu1 }
 0x2d1   :  { %v890_v38 = vrot.slane %v2006_v27, 7 }
 0x2d2   :  { %v515_v28 = vpop.f32.mrf.mxu0  ;;  %v1548_v29 = vpop.f32.mrf.mxu1 }
 0x2d3   :  { %v892_v44 = vsel %vm891_vm1, %v890_v38, %v2004_v25 }
 0x2d4   :  { %v1543_v30 = vpop.f32.mrf.mxu0  ;;  %v567_v31 = vpop.f32.mrf.mxu1 }
 0x2d6   :  { %v1549_v32 = vpop.f32.mrf.mxu1  ;;  %v616_v33 = vpop.f32.mrf.mxu0 }
 0x2d7   :  { %v893_v41 = vrot.slane %v616_v33, 6 }
 0x2d8   :  { %v1554_v34 = vpop.f32.mrf.mxu0  ;;  %v668_v35 = vpop.f32.mrf.mxu1 }
 0x2d9   :  { %v896_v45 = vrot.slane %v668_v35, 5  ;;  %v895_v48 = vsel %vm894_vm2, %v893_v41, %v892_v44 }
 0x2da   :  { %v619_v36 = vpop.f32.mrf.mxu0  ;;  %v1560_v37 = vpop.f32.mrf.mxu1 }
 0x2db   :  { %v898_v52 = vsel %vm897_vm3, %v896_v45, %v895_v48 }
 0x2dc   :  { %v1555_v39 = vpop.f32.mrf.mxu0  ;;  %v671_v40 = vpop.f32.mrf.mxu1 }
 0x2de   :  { %v1561_v42 = vpop.f32.mrf.mxu1  ;;  %v720_v43 = vpop.f32.mrf.mxu0 }
 0x2df   :  { %v899_v49 = vrot.slane %v720_v43, 4 }
 0x2e0   :  { %v1566_v46 = vpop.f32.mrf.mxu0  ;;  %v772_v47 = vpop.f32.mrf.mxu1 }
 0x2e1   :  { %v902_v53 = vrot.slane %v772_v47, 3  ;;  %v901_v56 = vsel %vm900_vm4, %v899_v49, %v898_v52 }
 0x2e2   :  { %v723_v50 = vpop.f32.mrf.mxu0  ;;  %v1572_v51 = vpop.f32.mrf.mxu1 }
 0x2e3   :  { %v904_v63 = vsel %vm903_vm5, %v902_v53, %v901_v56 }
 0x2e4   :  { %v1567_v54 = vpop.f32.mrf.mxu0  ;;  %v775_v55 = vpop.f32.mrf.mxu1 }
 0x2e6   :  { %v1573_v57 = vpop.f32.mrf.mxu1  ;;  %v824_v58 = vpop.f32.mrf.mxu0 }
 0x2e7   :  { %v905_v59 = vrot.slane %v824_v58, 2 }
 0x2e8   :  { %v1578_v60 = vpop.f32.mrf.mxu0  ;;  %v876_v61 = vpop.f32.mrf.mxu1 }
 0x2e9   :  { %v908_v1 = vrot.slane %v876_v61, 1  ;;  %v907_v3 = vsel %vm906_vm6, %v905_v59, %v904_v63 }
 0x2ea   :  { %v827_v4 = vpop.f32.mrf.mxu0  ;;  %v1584_v5 = vpop.f32.mrf.mxu1 }
 0x2eb   :  { %v910_v6 = vsel %vm909_vm7, %v908_v1, %v907_v3 }
 0x2ec   :  { %v1579_v7 = vpop.f32.mrf.mxu0  ;;  %v879_v9 = vpop.f32.mrf.mxu1  ;;  %v913_v11 = vsel %vm912_vm8, %v910_v6, -inf }
 0x2ed   :  { %914 = vmax.xlane.f32.xlu0 %v913_v11 }
 0x2ee   :  { %v1585_v12 = vpop.f32.mrf.mxu1 }
 0x376   :  { %v915_v13 = vpop.xlane.xlu0 %914 }
 0x377   :  { %v917_v14 = vrot.slane %v915_v13, 1  ;;  %v918_v15 = vrot.slane %v915_v13, 2  ;;  %v919_v17 = vrot.slane %v915_v13, 3  ;;  %v920_v19 = vrot.slane %v915_v13, 4 }
 0x378   :  { %v921_v20 = vrot.slane %v915_v13, 5  ;;  %v922_v21 = vrot.slane %v915_v13, 6  ;;  %v923_v22 = vrot.slane %v915_v13, 7  ;;  %v932_v23 = vsub.f32 %v2004_v25, %v915_v13 }
 0x379   :  { %v933_v24 = vsub.f32 %v2006_v27, %v917_v14  ;;  %v934_v26 = vsub.f32 %v616_v33, %v918_v15  ;;  %v935_v28 = vsub.f32 %v668_v35, %v919_v17  ;;  %v936_v29 = vsub.f32 %v720_v43, %v920_v19 }
 0x37a   :  { %v937_v30 = vsub.f32 %v772_v47, %v921_v20  ;;  %v938_v31 = vsub.f32 %v824_v58, %v922_v21  ;;  %v940_v32 = vmul.f32 1.442695, %v932_v23  ;;  %v939_v38 = vsub.f32 %v876_v61, %v923_v22 }
 0x37b   :  { %v942_v34 = vmul.f32 1.442695, %v933_v24  ;;  %v944_v36 = vmul.f32 1.442695, %v934_v26  ;;  %v946_v37 = vmul.f32 1.442695, %v935_v28 }
 0x37c   :  { %1679 = vpow2.f32 %v940_v32  ;;  %v948_v39 = vmul.f32 1.442695, %v936_v29  ;;  %v950_v40 = vmul.f32 1.442695, %v937_v30  ;;  %v952_v41 = vmul.f32 1.442695, %v938_v31 }
 0x37d   :  { %1681 = vpow2.f32 %v942_v34  ;;  %v954_v25 = vmul.f32 1.442695, %v939_v38 }
 0x37e   :  { %1683 = vpow2.f32 %v944_v36 }
 0x37f   :  { %1685 = vpow2.f32 %v946_v37 }
 0x380   :  { %1687 = vpow2.f32 %v948_v39 }
 0x381   :  { %1689 = vpow2.f32 %v950_v40 }
 0x382   :  { %1691 = vpow2.f32 %v952_v41 }
 0x383   :  { %1693 = vpow2.f32 %v954_v25 }
 0x389   :  { %v1680_v27 = vpop.eup %1679 }
 0x38a   :  { %v1682_v33 = vpop.eup %1681 }
 0x38b   :  { %v1684_v35 = vpop.eup %1683  ;;  %v964_v42 = vrot.slane %v1682_v33, 7 }
 0x38c   :  { %v1686_v43 = vpop.eup %1685  ;;  %v966_v44 = vrot.slane %v1684_v35, 6 }
 0x38d   :  { %v1688_v45 = vpop.eup %1687  ;;  %v965_v46 = vsel %vm891_vm1, %v964_v42, %v1680_v27  ;;  %v968_v47 = vrot.slane %v1686_v43, 5 }
 0x38e   :  { %v1690_v48 = vpop.eup %1689  ;;  %v967_v49 = vsel %vm894_vm2, %v966_v44, %v965_v46  ;;  %v970_v50 = vrot.slane %v1688_v45, 4 }
 0x38f   :  { %v1692_v51 = vpop.eup %1691  ;;  %v969_v52 = vsel %vm897_vm3, %v968_v47, %v967_v49  ;;  %v972_v53 = vrot.slane %v1690_v48, 3 }
 0x390   :  { %v1694_v54 = vpop.eup %1693  ;;  %v971_v55 = vsel %vm900_vm4, %v970_v50, %v969_v52  ;;  %v974_v56 = vrot.slane %v1692_v51, 2 }
 0x391   :  { %v973_v57 = vsel %vm903_vm5, %v972_v53, %v971_v55  ;;  %v976_v58 = vrot.slane %v1694_v54, 1 }
 0x392   :  { %v975_v59 = vsel %vm906_vm6, %v974_v56, %v973_v57 }
 0x393   :  { %v977_v60 = vsel %vm909_vm7, %v976_v58, %v975_v59 }
 0x394   :  { %v979_v61 = vsel %vm912_vm8, %v977_v60, 0.0 }
 0x395   :  { %980 = vadd.xlane.f32.xlu0 %v979_v61 }
 0x41e   :  { %v981_v63 = vpop.xlane.xlu0 %980 }
 0x41f   :  { %1695 = vrcp.f32 %v981_v63 }
 0x42c   :  { %v1696_v1 = vpop.eup %1695 }
 0x42d   :  { %v999_v3 = vmul.f32 %v1696_v1, %v1680_v27  ;;  %v984_v4 = vrot.slane %v1696_v1, 1  ;;  %v985_v7 = vrot.slane %v1696_v1, 2  ;;  %v986_v11 = vrot.slane %v1696_v1, 3 }
 0x42e   :  { %v987_v15 = vrot.slane %v1696_v1, 4  ;;  %v988_v17 = vrot.slane %v1696_v1, 5  ;;  %v989_v21 = vrot.slane %v1696_v1, 6  ;;  %v990_v22 = vrot.slane %v1696_v1, 7 }
 0x42f   :  { %v1007_v5 = vpack.c.bf16 %v999_v3, %v999_v3  ;;  %v1000_v6 = vmul.f32 %v1682_v33, %v984_v4  ;;  %v1001_v12 = vmul.f32 %v1684_v35, %v985_v7  ;;  %v1002_v13 = vmul.f32 %v1686_v43, %v986_v11 }
 0x430   :  { %v1004_v19 = vmul.f32 %v1690_v48, %v988_v17  ;;  %v1006_v23 = vmul.f32 %v1694_v54, %v990_v22 }
 0x431   :  { %1589 = vmatmul.mubr.msk.bf16.vlgmr.msra.gmra.mxu0 %vm912_vm8, %v1007_v5  ;;  %v1008_v9 = vpack.c.bf16 %v1000_v6, %v1000_v6  ;;  %v1009_v14 = vpack.c.bf16 %v1001_v12, %v1001_v12 }
 0x432   :  { %1599 = vmatpush3.bf16.msra.mxu0 %v1960_v62  ;;  %1600 = vmatprep.mubr.msk.bf16.mxu0 %vm1835_vm0, %v1834_v0  ;;  %v1010_v62 = vpack.c.bf16 %v1002_v13, %v1002_v13  ;;  %v1014_v26 = vpack.c.bf16 %v1006_v23, %v1006_v23 }
 0x433   :  { %1595 = vmatmul.mubr.msk.bf16.vlgmr.msra.gmra.mxu1 %vm912_vm8, %v1008_v9  ;;  %1610 = vmatprep.subr.bf16.mxu0 %v1834_v0 }
 0x434   :  { %1605 = vmatpush3.bf16.msra.mxu1 %v1962_v2  ;;  %1606 = vmatprep.mubr.msk.bf16.mxu1 %vm1835_vm0, %v1834_v0  ;;  %v1003_v2 = vmul.f32 %v1688_v45, %v987_v15 }
 0x435   :  { %1616 = vmatprep.subr.bf16.mxu1 %v1834_v0 }
 0x436   :  { %v1011_v20 = vpack.c.bf16 %v1003_v2, %v1003_v2 }
 0x439   :  { %1601 = vmatmul.mubr.msk.bf16.vlgmr.msra.gmra.mxu0 %vm912_vm8, %v1009_v14 }
 0x43a   :  { %1611 = vmatpush3.bf16.msra.mxu0 %v1972_v8  ;;  %1612 = vmatprep.mubr.msk.bf16.mxu0 %vm1835_vm0, %v1834_v0  ;;  %v1012_v8 = vpack.c.bf16 %v1004_v19, %v1004_v19 }
 0x43b   :  { %1607 = vmatmul.mubr.msk.bf16.vlgmr.msra.gmra.mxu1 %vm912_vm8, %v1010_v62  ;;  %1622 = vmatprep.subr.bf16.mxu0 %v1834_v0 }
 0x43c   :  { %1617 = vmatpush3.bf16.msra.mxu1 %v1974_v10  ;;  %1618 = vmatprep.mubr.msk.bf16.mxu1 %vm1835_vm0, %v1834_v0  ;;  %v1005_v10 = vmul.f32 %v1692_v51, %v989_v21 }
 0x43d   :  { %1628 = vmatprep.subr.bf16.mxu1 %v1834_v0 }
 0x43e   :  { %v1013_v24 = vpack.c.bf16 %v1005_v10, %v1005_v10 }
 0x441   :  { %1613 = vmatmul.mubr.msk.bf16.vlgmr.msra.gmra.mxu0 %vm912_vm8, %v1011_v20 }
 0x442   :  { %1623 = vmatpush3.bf16.msra.mxu0 %v1984_v16  ;;  %1624 = vmatprep.mubr.msk.bf16.mxu0 %vm1835_vm0, %v1834_v0 }
 0x443   :  { %1619 = vmatmul.mubr.msk.bf16.vlgmr.msra.gmra.mxu1 %vm912_vm8, %v1012_v8 }
 0x444   :  { %1629 = vmatpush3.bf16.msra.mxu1 %v1986_v18  ;;  %1630 = vmatprep.mubr.msk.bf16.mxu1 %vm1835_vm0, %v1834_v0 }
 0x449   :  { %1625 = vmatmul.mubr.msk.bf16.vlgmr.msra.gmra.mxu0 %vm912_vm8, %v1013_v24 }
 0x44b   :  { %1631 = vmatmul.mubr.msk.bf16.vlgmr.msra.gmra.mxu1 %vm912_vm8, %v1014_v26 }
 0x4f1   :  { %v1052_v28 = vpop.f32.mrf.mxu0 }
 0x4f3   :  { %v1590_v16 = vpop.f32.mrf.mxu0  ;;  %v1095_v29 = vpop.f32.mrf.mxu1 }
 0x4f4   :  { %v1367_v40 = vrot.slane %v1095_v29, 7 }
 0x4f5   :  { %v1055_v30 = vpop.f32.mrf.mxu0  ;;  %v1596_v31 = vpop.f32.mrf.mxu1 }
 0x4f6   :  { %v1368_v42 = vsel %vm891_vm1, %v1367_v40, %v1052_v28 }
 0x4f7   :  { %v1591_v32 = vpop.f32.mrf.mxu0  ;;  %v1098_v34 = vpop.f32.mrf.mxu1 }
 0x4f9   :  { %v1597_v36 = vpop.f32.mrf.mxu1  ;;  %v1138_v37 = vpop.f32.mrf.mxu0 }
 0x4fa   :  { %v1369_v27 = vrot.slane %v1138_v37, 6 }
 0x4fb   :  { %v1602_v18 = vpop.f32.mrf.mxu0  ;;  %v1181_v38 = vpop.f32.mrf.mxu1 }
 0x4fc   :  { %v1371_v43 = vrot.slane %v1181_v38, 5  ;;  %v1370_v46 = vsel %vm894_vm2, %v1369_v27, %v1368_v42 }
 0x4fd   :  { %v1141_v39 = vpop.f32.mrf.mxu0  ;;  %v1608_v0 = vpop.f32.mrf.mxu1 }
 0x4fe   :  { %v1372_v50 = vsel %vm897_vm3, %v1371_v43, %v1370_v46 }
 0x4ff   :  { %v1603_v41 = vpop.f32.mrf.mxu0  ;;  %v1184_v25 = vpop.f32.mrf.mxu1 }
 0x501   :  { %v1609_v33 = vpop.f32.mrf.mxu1  ;;  %v1224_v35 = vpop.f32.mrf.mxu0 }
 0x502   :  { %v1373_v47 = vrot.slane %v1224_v35, 4 }
 0x503   :  { %v1614_v44 = vpop.f32.mrf.mxu0  ;;  %v1267_v45 = vpop.f32.mrf.mxu1 }
 0x504   :  { %v1375_v51 = vrot.slane %v1267_v45, 3  ;;  %v1374_v54 = vsel %vm900_vm4, %v1373_v47, %v1372_v50 }
 0x505   :  { %v1227_v48 = vpop.f32.mrf.mxu0  ;;  %v1620_v49 = vpop.f32.mrf.mxu1 }
 0x506   :  { %v1376_v58 = vsel %vm903_vm5, %v1375_v51, %v1374_v54 }
 0x507   :  { %v1615_v52 = vpop.f32.mrf.mxu0  ;;  %v1270_v53 = vpop.f32.mrf.mxu1 }
 0x509   :  { %v1621_v55 = vpop.f32.mrf.mxu1  ;;  %v1310_v56 = vpop.f32.mrf.mxu0 }
 0x50a   :  { %v1377_v57 = vrot.slane %v1310_v56, 2 }
 0x50b   :  { %v1626_v59 = vpop.f32.mrf.mxu0  ;;  %v1353_v60 = vpop.f32.mrf.mxu1 }
 0x50c   :  { %v1379_v61 = vrot.slane %v1353_v60, 1  ;;  %v1378_v63 = vsel %vm906_vm6, %v1377_v57, %v1376_v58 }
 0x50d   :  { %v1313_v1 = vpop.f32.mrf.mxu0  ;;  %v1632_v3 = vpop.f32.mrf.mxu1 }
 0x50e   :  { %v1380_v4 = vsel %vm909_vm7, %v1379_v61, %v1378_v63 }
 0x50f   :  { %v1627_v5 = vpop.f32.mrf.mxu0  ;;  %v1356_v6 = vpop.f32.mrf.mxu1  ;;  %1382 = vst [vmem:[#allocation13] sm:$0xff] %v1380_v4 }
 0x510   :  { %1810 = shalt.err (!%p1807_p7)
}
 0x511   :  { %1392 = dma.vmem_to_hbm [thread:$0]  %s1390_s7, 128, %s2077_s9, [#allocation6]   ;;  %v1633_v7 = vpop.f32.mrf.mxu1 }
 0x512   :  { %1825 = dma.done.wait [#allocation6], 128  }
 0x513   :  { %1826 = vsyncadd [#allocation6], 4294967168 }
 0x514   :  { %1396 = vsyncpa [#allocation5], 1 }
 0x515   :  { %1397 = vsyncpa [#allocation8], 1 }
 0x516   :  { %1398 = vsyncpa [#allocation11], 1 }
 0x517   :  { %1399 = vsyncpa [#allocation6], 1 }

</bundles_post_ra>
